<compile_context>
chip_gen: v5e
topology: v5e:2x2
jax: 0.10.0
libtpu: 0.0.40
codegen_flags: <defaults>
</compile_context>

<pallas_src>
import functools

import jax
import jax.numpy as jnp
from jax import lax
from jax.experimental import pallas as pl
from jax.experimental.pallas import tpu as pltpu


def _round_up(x, m):
    return (x + m - 1) // m * m


def _bigram_kernel(tile_n, compute_loss, idx_smem, *refs):
    """idx_smem: (N_pad,) int32 token ids in SMEM (scalar prefetch).

    With loss:    refs = (tgt_ref, table_hbm, logits_ref, nll_ref, rows, sem)
    Without loss: refs = (table_hbm, logits_ref, rows, sem)
    """
    if compute_loss:
        tgt_ref, table_hbm, logits_ref, nll_ref, rows_vmem, sem = refs
    else:
        table_hbm, logits_ref, rows_vmem, sem = refs

    t = pl.program_id(0)
    base = t * tile_n

    # ---- Row gather: DMA table[idx[r], :] -> rows_vmem[r, :] --------------
    # All copies are issued back-to-back (they overlap each other), then
    # drained before the vector compute touches the gathered rows.
    @pl.loop(0, tile_n)
    def _issue(r):
        tok = idx_smem[base + r]
        pltpu.make_async_copy(
            table_hbm.at[pl.ds(tok, 1), :],
            rows_vmem.at[pl.ds(r, 1), :],
            sem,
        ).start()

    @pl.loop(0, tile_n)
    def _drain(r):
        pltpu.make_async_copy(
            table_hbm.at[pl.ds(0, 1), :],
            rows_vmem.at[pl.ds(r, 1), :],
            sem,
        ).wait()

    rows = rows_vmem[...]                       # (tile_n, V_pad) f32
    logits_ref[...] = rows                      # lane-dense writeback

    # ---- Cross entropy (only compiled for the targets-given variant) ------
    if compute_loss:
        # Padded vocab columns hold -1e30, so exp() underflows to 0 and the
        # log-sum-exp over the padded width is exact.
        m = jnp.max(rows, axis=-1, keepdims=True)                       # (tile_n,1)
        lse = m + jnp.log(jnp.sum(jnp.exp(rows - m), axis=-1, keepdims=True))
        cols = lax.broadcasted_iota(jnp.int32, rows.shape, 1)
        tgt_logit = jnp.sum(jnp.where(cols == tgt_ref[...], rows, 0.0),
                            axis=-1, keepdims=True)                     # (tile_n,1)
        nll_ref[...] = lse - tgt_logit          # per-row NLL; mean in wrapper


def bigram_forward(idx, table, targets=None, *, tile_n=256):
    """Mirrors BigramLanguageModel.forward.

    idx:     (B, T) int token ids
    table:   (V, V) float32 embedding table (nn.Embedding weight)
    targets: optional (B, T) int token ids

    Returns (logits, loss):
      targets is None -> logits (B, T, V), loss None
      targets given   -> logits (B*T, V) (same as torch .view), scalar loss
    """
    B, T = idx.shape
    V = table.shape[0]
    N = B * T

    tile_n = _round_up(max(1, min(tile_n, N)), 8)
    n_pad = _round_up(N, tile_n)
    v_pad = _round_up(V, 128)
    num_tiles = n_pad // tile_n

    # Lane-pad the vocab axis to 128; padded columns get a large negative
    # value so they drop out of the softmax / LSE.
    neg = jnp.float32(-1e30)
    table_p = jnp.full((V, v_pad), neg, dtype=jnp.float32)
    table_p = table_p.at[:, :V].set(table.astype(jnp.float32))

    idx_flat = jnp.zeros((n_pad,), jnp.int32).at[:N].set(
        idx.reshape(N).astype(jnp.int32))

    compute_loss = targets is not None
    kernel = functools.partial(_bigram_kernel, tile_n, compute_loss)

    scratch_shapes = [
        pltpu.VMEM((tile_n, v_pad), jnp.float32),   # gathered table rows
        pltpu.SemaphoreType.DMA,                    # shared gather semaphore
    ]
    compiler_params = pltpu.CompilerParams(
        dimension_semantics=("parallel",))

    logits_spec = pl.BlockSpec((tile_n, v_pad), lambda t, idx_ref: (t, 0))

    if compute_loss:
        tgt_col = jnp.zeros((n_pad, 1), jnp.int32).at[:N, 0].set(
            targets.reshape(N).astype(jnp.int32))
        grid_spec = pltpu.PrefetchScalarGridSpec(
            num_scalar_prefetch=1,
            grid=(num_tiles,),
            in_specs=[
                pl.BlockSpec((tile_n, 1), lambda t, idx_ref: (t, 0)),  # targets
                pl.BlockSpec(memory_space=pl.ANY),                     # table (HBM)
            ],
            out_specs=(
                logits_spec,
                pl.BlockSpec((tile_n, 1), lambda t, idx_ref: (t, 0)),  # per-row NLL
            ),
            scratch_shapes=scratch_shapes,
        )
        logits_p, nll = pl.pallas_call(
            kernel,
            grid_spec=grid_spec,
            out_shape=(
                jax.ShapeDtypeStruct((n_pad, v_pad), jnp.float32),
                jax.ShapeDtypeStruct((n_pad, 1), jnp.float32),
            ),
            compiler_params=compiler_params,
        )(idx_flat, tgt_col, table_p)
        logits = logits_p[:N, :V]
        loss = jnp.mean(nll[:N, 0])
        return logits, loss

    # targets is None: gather-only kernel, no cross-entropy work compiled in.
    grid_spec = pltpu.PrefetchScalarGridSpec(
        num_scalar_prefetch=1,
        grid=(num_tiles,),
        in_specs=[pl.BlockSpec(memory_space=pl.ANY)],
        out_specs=logits_spec,
        scratch_shapes=scratch_shapes,
    )
    logits_p = pl.pallas_call(
        kernel,
        grid_spec=grid_spec,
        out_shape=jax.ShapeDtypeStruct((n_pad, v_pad), jnp.float32),
        compiler_params=compiler_params,
    )(idx_flat, table_p)
    return logits_p[:N, :V].reshape(B, T, V), None


if __name__ == "__main__":
    # Small shapes consistent with the module: batch=2, seq=8, vocab=32.
    B, T, V = 2, 8, 32

    key = jax.random.PRNGKey(0)
    k_table, k_idx, k_tgt = jax.random.split(key, 3)

    # nn.Embedding default init: N(0, 1).
    table = jax.random.normal(k_table, (V, V), dtype=jnp.float32)
    idx = jax.random.randint(k_idx, (B, T), 0, V, dtype=jnp.int32)
    targets = jax.random.randint(k_tgt, (B, T), 0, V, dtype=jnp.int32)

    # tile_n=8 -> 2 grid tiles at N=16, exercising the tiled/pipelined path.
    logits, loss = bigram_forward(idx, table, targets, tile_n=8)
    jax.block_until_ready((logits, loss))

    logits_nt, loss_nt = bigram_forward(idx, table, None, tile_n=8)
    jax.block_until_ready(logits_nt)

    # Reference check against plain JAX.
    ref_logits = table[idx.reshape(-1)]                              # (N, V)
    ref_lse = jax.nn.logsumexp(ref_logits, axis=-1)
    ref_nll = ref_lse - ref_logits[jnp.arange(B * T), targets.reshape(-1)]
    ref_loss = jnp.mean(ref_nll)

    assert logits.shape == (B * T, V)
    assert logits_nt.shape == (B, T, V)
    assert loss_nt is None
    assert jnp.allclose(logits, ref_logits, atol=1e-5)
    assert jnp.allclose(logits_nt.reshape(B * T, V), ref_logits, atol=1e-5)
    assert jnp.allclose(loss, ref_loss, atol=1e-5)

    print("KERNEL_OK")
</pallas_src>

<mosaic_0001>
module attributes {stable_mosaic.version = 11 : i64} {
  func.func @_bigram_kernel(%arg0: i32, %arg1: memref<16xi32, #tpu.memory_space<smem>>, %arg2: memref<8x1xi32, #tpu.memory_space<vmem>>, %arg3: memref<32x128xf32, #tpu.memory_space<any>>, %arg4: memref<8x128xf32, #tpu.memory_space<vmem>>, %arg5: memref<8x1xf32, #tpu.memory_space<vmem>>, %arg6: memref<8x128xf32, #tpu.memory_space<vmem>>, %arg7: memref<!tpu.dma_semaphore, #tpu.memory_space<semaphore_mem>>) attributes {dimension_semantics = [#tpu.dimension_semantics<parallel>], iteration_bounds = array<i64: 2>, scalar_prefetch = 1 : i64, scratch_operands = 2 : i64, tpu.core_type = #tpu.core_type<tc>, window_params = [{transform_indices = @transform_0, window_bounds = array<i64: 8, 1>}, {}, {transform_indices = @transform_2, window_bounds = array<i64: 8, 128>}, {transform_indices = @transform_3, window_bounds = array<i64: 8, 1>}]} {
    %c8_i32 = arith.constant 8 : i32
    %0 = arith.muli %arg0, %c8_i32 : i32
    %c0_i32 = arith.constant 0 : i32
    %c8_i32_0 = arith.constant 8 : i32
    %1 = arith.addi %c0_i32, %c8_i32_0 : i32
    %c1_i32 = arith.constant 1 : i32
    scf.for %arg8 = %c0_i32 to %1 step %c1_i32  : i32 {
      %c1_i32_16 = arith.constant 1 : i32
      %24 = arith.muli %arg8, %c1_i32_16 : i32
      %c0_i32_17 = arith.constant 0 : i32
      %25 = arith.addi %c0_i32_17, %24 : i32
      %26 = arith.addi %0, %25 : i32
      %27 = arith.index_cast %26 : i32 to index
      %28 = memref.load %arg1[%27] : memref<16xi32, #tpu.memory_space<smem>>
      %c0_i32_18 = arith.constant 0 : i32
      %29 = tpu.memref_slice %arg3[%28, %c0_i32_18] : memref<32x128xf32, #tpu.memory_space<any>> -> memref<1x128xf32, #tpu.memory_space<any>>
      %c0_i32_19 = arith.constant 0 : i32
      %30 = tpu.memref_slice %arg6[%25, %c0_i32_19] : memref<8x128xf32, #tpu.memory_space<vmem>> -> memref<1x128xf32, #tpu.memory_space<vmem>>
      tpu.enqueue_dma source(%29 : memref<1x128xf32, #tpu.memory_space<any>>) target(%30 : memref<1x128xf32, #tpu.memory_space<vmem>>) target_semaphore(%arg7 : memref<!tpu.dma_semaphore, #tpu.memory_space<semaphore_mem>>)
    }
    %c8_i32_1 = arith.constant 8 : i32
    %c0_i32_2 = arith.constant 0 : i32
    %c8_i32_3 = arith.constant 8 : i32
    %2 = arith.addi %c0_i32_2, %c8_i32_3 : i32
    %c1_i32_4 = arith.constant 1 : i32
    scf.for %arg8 = %c0_i32_2 to %2 step %c1_i32_4  : i32 {
      %c1_i32_16 = arith.constant 1 : i32
      %24 = arith.muli %arg8, %c1_i32_16 : i32
      %c0_i32_17 = arith.constant 0 : i32
      %25 = arith.addi %c0_i32_17, %24 : i32
      %c0_i32_18 = arith.constant 0 : i32
      %c0_i32_19 = arith.constant 0 : i32
      %26 = tpu.memref_slice %arg3[%c0_i32_18, %c0_i32_19] : memref<32x128xf32, #tpu.memory_space<any>> -> memref<1x128xf32, #tpu.memory_space<any>>
      %c0_i32_20 = arith.constant 0 : i32
      %27 = tpu.memref_slice %arg6[%25, %c0_i32_20] : memref<8x128xf32, #tpu.memory_space<vmem>> -> memref<1x128xf32, #tpu.memory_space<vmem>>
      tpu.wait_dma2 semaphore(%arg7 : memref<!tpu.dma_semaphore, #tpu.memory_space<semaphore_mem>>) src(%26 : memref<1x128xf32, #tpu.memory_space<any>>) dst(%27 : memref<1x128xf32, #tpu.memory_space<vmem>>)
    }
    %c8_i32_5 = arith.constant 8 : i32
    %c0 = arith.constant 0 : index
    %c0_6 = arith.constant 0 : index
    %3 = vector.load %arg6[%c0, %c0_6] : memref<8x128xf32, #tpu.memory_space<vmem>>, vector<8x128xf32>
    %c0_7 = arith.constant 0 : index
    %c0_8 = arith.constant 0 : index
    %4 = vector.load %arg4[%c0_7, %c0_8] : memref<8x128xf32, #tpu.memory_space<vmem>>, vector<8x128xf32>
    tpu.vector_store %arg4[%c0_7, %c0_8], %3 {strides = array<i32>} : memref<8x128xf32, #tpu.memory_space<vmem>>, vector<8x128xf32>,
    %cst = arith.constant dense<0xFF800000> : vector<8xf32>
    %5 = vector.multi_reduction <maximumf>, %3, %cst [1] : vector<8x128xf32> to vector<8xf32>
    %6 = vector.shape_cast %5 : vector<8xf32> to vector<8x1xf32>
    %7 = vector.broadcast %6 : vector<8x1xf32> to vector<8x128xf32>
    %8 = arith.subf %3, %7 : vector<8x128xf32>
    %9 = math.exp %8 : vector<8x128xf32>
    %cst_9 = arith.constant dense<0.000000e+00> : vector<8xf32>
    %10 = vector.multi_reduction <add>, %9, %cst_9 [1] : vector<8x128xf32> to vector<8xf32>
    %11 = vector.shape_cast %10 : vector<8xf32> to vector<8x1xf32>
    %12 = math.log %11 : vector<8x1xf32>
    %13 = arith.addf %6, %12 : vector<8x1xf32>
    %14 = tpu.iota {dimensions = array<i32: 1>} : vector<8x128xi32>
    %c0_10 = arith.constant 0 : index
    %c0_11 = arith.constant 0 : index
    %15 = vector.load %arg2[%c0_10, %c0_11] : memref<8x1xi32, #tpu.memory_space<vmem>>, vector<8x1xi32>
    %16 = vector.broadcast %15 : vector<8x1xi32> to vector<8x128xi32>
    %17 = arith.cmpi eq, %14, %16 : vector<8x128xi32>
    %cst_12 = arith.constant 0.000000e+00 : f32
    %18 = vector.broadcast %cst_12 : f32 to vector<8x128xf32>
    %19 = arith.select %17, %3, %18 : vector<8x128xi1>, vector<8x128xf32>
    %cst_13 = arith.constant dense<0.000000e+00> : vector<8xf32>
    %20 = vector.multi_reduction <add>, %19, %cst_13 [1] : vector<8x128xf32> to vector<8xf32>
    %21 = vector.shape_cast %20 : vector<8xf32> to vector<8x1xf32>
    %22 = arith.subf %13, %21 : vector<8x1xf32>
    %c0_14 = arith.constant 0 : index
    %c0_15 = arith.constant 0 : index
    %23 = vector.load %arg5[%c0_14, %c0_15] : memref<8x1xf32, #tpu.memory_space<vmem>>, vector<8x1xf32>
    tpu.vector_store %arg5[%c0_14, %c0_15], %22 {strides = array<i32>} : memref<8x1xf32, #tpu.memory_space<vmem>>, vector<8x1xf32>,
    return
  }
  func.func @transform_0(%arg0: i32, %arg1: memref<16xi32, #tpu.memory_space<smem>>) -> (i32, i32) {
    %c0_i32 = arith.constant 0 : i32
    %c0_i32_0 = arith.constant 0 : i32
    return %arg0, %c0_i32 : i32, i32
  }
  func.func @transform_2(%arg0: i32, %arg1: memref<16xi32, #tpu.memory_space<smem>>) -> (i32, i32) {
    %c0_i32 = arith.constant 0 : i32
    %c0_i32_0 = arith.constant 0 : i32
    return %arg0, %c0_i32 : i32, i32
  }
  func.func @transform_3(%arg0: i32, %arg1: memref<16xi32, #tpu.memory_space<smem>>) -> (i32, i32) {
    %c0_i32 = arith.constant 0 : i32
    %c0_i32_0 = arith.constant 0 : i32
    return %arg0, %c0_i32 : i32, i32
  }
}

</mosaic_0001>

<bundles_post_ra>
// kernel: tpu_custom_call.1
= control target key start
LH: loop header
LB: loop body
LE: loop exit
PB: predicated region body
PF: predicated region fallthrough
CT: control target
= control target key end

     0   :  { %s537_s18 = smov [#allocation5]   ;;  %s696_s0 = inlined_call_operand.vmem [shape: s32[16], index: 0, kind: input, shape index: {}]   ;;  %s697_s1 = inlined_call_operand.vmem [shape: s32[16,1], index: 1, kind: input, shape index: {}]   ;;  %s698_s2 = inlined_call_operand.hbm [shape: f32[32,128], index: 2, kind: input, shape index: {}]   ;;  %s699_s3 = inlined_call_operand.hbm [shape: f32[16,128], index: 3, kind: output, shape index: {0}]   ;;  %s700_s4 = inlined_call_operand.vmem [shape: f32[16,1], index: 4, kind: output, shape index: {1}]  }
   0x1   :  { %702 = sst [smem:[#allocation15_spill]] %s697_s1  ;;  %s11_s17 = sshll.u32 %s696_s0, 4  ;;  %s12_s17 = int_to_ptr.vmem [resolvable:$true] %s11_s17 }
   0x2   :  { %14 = dma.vmem_to_smem %s12_s17, 16, %s537_s18, [#allocation4] }
   0x3   :  { %505 = dma.done.wait [#allocation4], 16 }
   0x4   :  { %506 = vsyncadd [#allocation4], 4294967280 }
   0x5   :  { %17 = sfence }
   0x6   :  { %18 = vsyncpa [#allocation7], 0 }
   0x7   :  { %20 = vsyncpa [#allocation7 + $0x1], 0  ;;  %s568_s19 = smov 0   ;;  %s570_s20 = smov 0  }
   0x8   :  { %s572_s21 = smov 0   ;;  %s574_s22 = smov 0  }
   0x9 LB: > { %s589_s0 = sadd.s32 4294967295, %s527_s22   ;;  %s342_s23 = sadd.s32 4294967294, %s527_s22   ;;  %s527_s22 = sphi %s574_s22, %s714_s22   ;;  %s523_s21 = sphi %s572_s21, %s713_s21   ;;  %s519_s20 = sphi %s570_s20, %s712_s20   ;;  %s515_s19 = sphi %s568_s19, %s711_s19  }
   0xa   : > { %s593_s24 = sadd.s32 1, %s527_s22   ;;  %s59_s25 = sadd.s32 1, %s523_s21 }
   0xb   : > { %s56_s26 = ssub.s32 %s527_s22, %s593_s24  ;;  %p69_p0 = scmp.ne.s32.totalorder %s523_s21, %s519_s20 }
   0xc   : > { %p57_p1 = scmp.eq.s32.totalorder %s56_s26, 0  ;;  %p70_p2 = scmp.eq.s32.totalorder %s589_s0, 1 }
   0xd   : > { %p75_p3 = scmp.ne.s32.totalorder %s519_s20, %s515_s19  ;;  %p76_p4 = scmp.eq.s32.totalorder %s342_s23, 1 }
   0xe   : > { %s604_s27 = scalar_select %p57_p1, %s523_s21, %s59_s25  }
   0xf   : > { %p606_p5 = por %p70_p2, %p69_p0  ;;  %p610_p6 = por %p76_p4, %p75_p3 }
  0x10   : > { %p345_p7 = scmp.ge.s32.totalorder %s527_s22, 1  ;;  %p127_p8 = scmp.lt.s32.totalorder %s527_s22, 3 }
  0x12   : > { %p128_p9 = pnand %p345_p7, %p127_p8 }
  0x13   : > { %s701_s30 = sand.u32 (!%p128_p9), 1, %s519_s20   ;;  %p152_p10 = scmp.lt.s32.totalorder (!%p128_p9), %s589_s0, 1 }
  0x14   : > { %131 = sbr.rel (%p128_p9) target bundleno = 328 (0x148), region = 24  ;;  %s620_s5 = sshll.u32 (!%p128_p9), %s701_s30, 3 }
  0x15   : > { %s705_s1 = sld [smem:[#allocation15_spill]] (!%p128_p9)  ;;  %s635_s16 = smov (!%p128_p9), 0  }
  0x19   : > { %s153_s7 = scalar_select %p152_p10, %s589_s0, 1 }
  0x1b   : > { %s347_s8 = sshll.u32 %s153_s7, 3 }
  0x1c   : > { %s627_s11 = scalar_lea.vmem %s705_s1, %s347_s8  ;;  %s632_s14 = scalar_lea.vmem %s700_s4, %s347_s8 }
  0x1d LB: >> { %s706_s6 = sshll.u32 %s589_s0, 3  ;;  %s170_s23 = scalar_lea.vmem [#allocation2], %s531_s16  ;;  %s531_s16 = sphi %s635_s16, %s166_s16  }
  0x1e   : >> { %s167_s17 = sadd.s32 %s531_s16, %s706_s6  ;;  %s180_s25 = sshll.u32 %s170_s23, 4  ;;  %s181_s25 = int_to_ptr.vmem [resolvable:$true] %s180_s25 }
  0x1f   : >> { %s168_s18 = sld [smem:[#allocation5 + %s167_s17]]  ;;  %s433_s15 = scalar_lea.hbm %s698_s2, 32 }
  0x25   : >> { %s169_s8 = scalar_lea.hbm %s698_s2, %s168_s18 }
  0x26   : >> { %s178_s9 = sshll.u32 %s169_s8, 4  ;;  %s179_s9 = int_to_ptr.hbm [resolvable:$true] %s178_s9 }
  0x27   : >> { %s429_s10 = sshra.s32 %s179_s9, 4  ;;  %s430_s10 = int_to_ptr.hbm [resolvable:$true] %s429_s10 }
  0x28   : >> { %s431_s12 = scalar_lea.hbm %s430_s10, 1  ;;  %p434_p12 = scmp.lt.s32.totalorder %s430_s10, %s698_s2 }
  0x29   : >> { %p432_p11 = scmp.ne.s32.totalorder %s430_s10, %s431_s12  ;;  %p435_p13 = scmp.lt.s32.totalorder %s433_s15, %s431_s12 }
  0x2b   : >> { %p436_p0 = por %p435_p13, %p434_p12 }
  0x2d   : >> { %p437_p1 = pnand %p436_p0, %p432_p11 }
  0x2f   : >> { %440 = shalt.err (!%p437_p1)  }
  0x30   : >> { %s441_s17 = sshra.s32 %s181_s25, 4  ;;  %s538_s23 = smov [#allocation2]   ;;  %s442_s17 = int_to_ptr.vmem [resolvable:$true] %s441_s17 }
  0x31   : >> { %s443_s18 = scalar_lea.vmem %s442_s17, 1  ;;  %s445_s26 = scalar_lea.vmem %s538_s23, 8 }
  0x32   : >> { %p444_p2 = scmp.ne.s32.totalorder %s442_s17, %s443_s18  ;;  %p446_p3 = scmp.lt.s32.totalorder %s442_s17, [#allocation2] }
  0x33   : >> { %p447_p4 = scmp.lt.s32.totalorder %s445_s26, %s443_s18 }
  0x35   : >> { %p448_p7 = por %p447_p4, %p446_p3 }
  0x37   : >> { %p449_p8 = pnand %p448_p7, %p444_p2 }
  0x39   : >> { %452 = shalt.err (!%p449_p8)  }
  0x3a   : >> { %183 = dma.hbm_to_vmem [thread:$0]  %s179_s9, 16, %s181_s25, [#allocation3] }
  0x3b   : >> { %s166_s16 = sadd.s32 1, %s531_s16  }
  0x3c   : >> { %p163_p9 = scmp.ge.s32.totalorder %s166_s16, 8  }
  0x3d   : > { %s533_s1 = smov (%p163_p9), 0  }
  0x3e   : > { %165 = sbr.rel (!%p163_p9) target bundleno = 29 (0x1d), region = 91 }
  0x43 LB: >> { %507 = dma.done.wait [#allocation3], 16  ;;  %s535_s1 = sphi %s533_s1, %s189_s1  }
  0x44   : >> { %508 = vsyncadd [#allocation3], 4294967280  ;;  %s189_s1 = sadd.s32 1, %s535_s1  }
  0x45   : >> { %p186_p10 = scmp.ge.s32.totalorder %s189_s1, 8  }
  0x46   : > { %v193_v0 = vld [vmem:[#allocation2] sm:$0xff] (%p186_p10)  ;;  %s707_s30 = scalar_lea.vmem (%p186_p10), [#allocation6], %s620_s5  ;;  %v539_v1 = vmov (%p186_p10), 0   ;;  %s708_s6 = sshll.u32 (%p186_p10), %s589_s0, 3  ;;  %v205_v7 = vlaneseq (%p186_p10) }
  0x47   : > { %188 = sbr.rel (!%p186_p10) target bundleno = 67 (0x43), region = 102  ;;  %195 = vmax.xlane.f32.xlu0 (%p186_p10), %v193_v0  ;;  %194 = vst [vmem:[%s707_s30] sm:$0xff] (%p186_p10), %v193_v0  ;;  %v207_v2 = vld [vmem:[%s627_s11] sm:$0xff] (%p186_p10)  ;;  %s233_s25 = scalar_lea.hbm (%p186_p10), %s699_s3, %s708_s6 }
  0x48   : > { %412 = vset.pattern.permute.xlu0 (%p186_p10), %v539_v1  ;;  %s709_s7 = smov (%p186_p10), %s707_s30  ;;  %s237_s9 = sshll.u32 (%p186_p10), %s233_s25, 4  ;;  %s238_s9 = int_to_ptr.hbm [resolvable:$true] %s237_s9 }
  0x49   : > { %s235_s8 = sshll.u32 (%p186_p10), %s709_s7, 4  ;;  %s710_s11 = sand.u32 (%p186_p10), 1, %s519_s20   ;;  %s236_s8 = int_to_ptr.vmem [resolvable:$true] %s235_s8 }
  0x4a   : > { %s219_s10 = scalar_lea.sflag (%p186_p10), [#allocation7], %s710_s11  ;;  %s467_s12 = sshra.s32 (%p186_p10), %s238_s9, 4  ;;  %s468_s12 = int_to_ptr.hbm [resolvable:$true] %s467_s12 }
  0x4b   : > { %s469_s13 = scalar_lea.hbm (%p186_p10), %s468_s12, 8  ;;  %s473_s18 = scalar_lea.hbm (%p186_p10), %s699_s3, 16 }
  0x4c   : > { %p470_p11 = scmp.ne.s32.totalorder %s468_s12, %s469_s13  ;;  %p474_p0 = scmp.lt.s32.totalorder %s468_s12, %s699_s3 }
  0x4d   : > { %p475_p1 = scmp.lt.s32.totalorder %s473_s18, %s469_s13 }
  0x4e   : > { %p471_p12 = pnand %p470_p11, %p606_p5 }
  0x4f   : > { %p476_p2 = por %p475_p1, %p474_p0 }
  0x50   : > { %p472_p13 = pneg %p471_p12 }
  0x52   : > { %p477_p3 = pnand %p476_p2, %p472_p13 }
  0x5b   : > { %209 = vperm.xlu0 %412, %v207_v2  }
  0xba   : > { %v196_v3 = vpop.xlane.xlu0 %195 }
  0xbb   : > { %v197_v4 = vsub.f32 %v193_v0, %v196_v3 }
  0xbd   : > { %v198_v5 = vmul.f32 1.442695, %v197_v4 }
  0xbf   : > { %413 = vpow2.f32 %v198_v5 }
  0xc5   : > { %v414_v6 = vpop.eup %413 }
  0xc6   : > { %200 = vadd.xlane.f32.xlu1 %v414_v6 }
  0xc7   : > { %480 = shalt.err (!%p477_p3)
}
  0xc8   : > { %355 = dma.vmem_to_hbm [thread:$0]  (%p606_p5), %s236_s8, 128, %s238_s9, %s219_s10   ;;  %v206_v8 = vand.u32 127, %v205_v7  ;;  %vm216_vm1 = vcmask 7168  }
  0xcd   : > { %v210_v9 = vpop.permute.xlu0 %209 }
  0xce   : > { %vm211_vm0 = vcmp.eq.s32.totalorder %v206_v8, %v210_v9 }
  0xcf   : > { %v212_v10 = vsel %vm211_vm0, %v193_v0, 0.0 }
  0xd0   : > { %213 = vadd.xlane.f32.xlu1 %v212_v10 }
 0x139   : > { %v201_v11 = vpop.xlane.xlu1 %200 }
 0x13a   : > { %415 = vlog2.f32 %v201_v11 }
 0x140   : > { %v416_v12 = vpop.eup %415 }
 0x141   : > { %v203_v13 = vmul.f32 0.6931472, %v416_v12 }
 0x143   : > { %v204_v14 = vadd.f32 %v203_v13, %v196_v3  ;;  %v214_v15 = vpop.xlane.xlu1 %213 }
 0x145   : > { %v215_v16 = vsub.f32 %v204_v14, %v214_v15 }
 0x147   : > { %217 = vst.msk [vmem:[%s632_s14] sm:$0xff] %vm216_vm1, %v215_v16 }
 0x148 PF: > { %p361_p4 = scmp.ge.s32.totalorder %s527_s22, 2  ;;  %s252_s28 = sand.u32 1, %s515_s19  }
 0x149   : > { %s253_s26 = scalar_lea.sflag [#allocation7], %s252_s28 }
 0x14a   : > { %p358_p5 = pnand %p361_p4, %p610_p6 }
 0x14c   : > { %p359_p7 = pneg %p358_p5 }
 0x14e   : > { %510 = dma.done.wait (%p359_p7), %s253_s26, 128  }
 0x14f   : > { %512 = vsyncadd (%p359_p7), %s253_s26, 4294967168  ;;  %p23_p8 = scmp.ge.s32.totalorder %s593_s24, 4   ;;  %s711_s19 = smov %s519_s20 }
 0x150   : > { %s712_s20 = smov %s523_s21  ;;  %s713_s21 = smov %s604_s27 }
 0x151   : > { %s714_s22 = smov %s593_s24  ;;  %25 = sbr.rel (!%p23_p8) target bundleno = 9 (0x9), region = 113 }
 0x156   :  { %266 = vsyncpa [#allocation7], 1 }
 0x157   :  { %268 = vsyncpa [#allocation7 + $0x1], 1 }
 0x158   :  { %269 = vsyncmov [#allocation3] }
 0x15b   :  { %s270_s22 = vpop.sfrf %269 }
 0x15c   :  { %p354_p6 = scmp.ne.s32.totalorder %s270_s22, 0 }
 0x15e   :  { %274 = shalt.err (%p354_p6)  }

</bundles_post_ra>
